<compile_context>
chip_gen: v5e
topology: v5e:2x2
jax: 0.10.0
libtpu: 0.0.40
codegen_flags: <defaults>
</compile_context>

<pallas_src>
import functools

import jax
import jax.numpy as jnp
from jax.experimental import pallas as pl
from jax.experimental.pallas import tpu as pltpu

_IN, _H1, _H2, _OUT = 8, 6, 4, 1
_DEFAULT_TILE_N = 2048  # lane tile (batch rows per grid step); multiple of 128


def _round_up(x, m):
    return (x + m - 1) // m * m


def _mlp_kernel(x_ref, p1_ref, p2_ref, p3_ref, o_ref):
    # x_ref: (8, T) batch-on-lanes tile.
    # p*_ref: [W | b] with W in torch layout (out, in); bias is the last column.
    # Each layer computes h = sigmoid(W @ h_prev + b); f32 accumulation throughout.
    xt = x_ref[...]                                                    # (8, T)
    h1 = jax.nn.sigmoid(
        jnp.dot(p1_ref[:, :_IN], xt, preferred_element_type=jnp.float32)
        + p1_ref[:, _IN:_IN + 1])                                      # (6, T)
    h2 = jax.nn.sigmoid(
        jnp.dot(p2_ref[:, :_H1], h1, preferred_element_type=jnp.float32)
        + p2_ref[:, _H1:_H1 + 1])                                      # (4, T)
    o_ref[...] = jax.nn.sigmoid(
        jnp.dot(p3_ref[:, :_H2], h2, preferred_element_type=jnp.float32)
        + p3_ref[:, _H2:_H2 + 1])                                      # (1, T)


@functools.partial(jax.jit, static_argnames=("tile_n",))
def mlp_forward(x, w1, b1, w2, b2, w3, b3, *, tile_n=_DEFAULT_TILE_N):
    """y = sigmoid(L3(sigmoid(L2(sigmoid(L1(x)))))), weights in torch (out, in) layout."""
    n, d = x.shape
    assert d == _IN
    # Lane tile: multiple of 128; don't over-pad tiny batches.
    tile = min(tile_n, _round_up(n, 128))
    n_pad = _round_up(n, tile)

    # Layout plumbing in the wrapper (batch-on-lanes + zero-pad the batch).
    xt = jnp.zeros((_IN, n_pad), jnp.float32).at[:, :n].set(x.T.astype(jnp.float32))

    # Fold biases into the weight operands: one (out, in+1) block per layer.
    p1 = jnp.concatenate([w1, b1[:, None]], axis=1)  # (6, 9)
    p2 = jnp.concatenate([w2, b2[:, None]], axis=1)  # (4, 7)
    p3 = jnp.concatenate([w3, b3[:, None]], axis=1)  # (1, 5)

    const = lambda shape: pl.BlockSpec(shape, lambda i: (0, 0))  # VMEM-resident params
    out_t = pl.pallas_call(
        _mlp_kernel,
        out_shape=jax.ShapeDtypeStruct((1, n_pad), jnp.float32),
        grid=(n_pad // tile,),
        in_specs=[
            pl.BlockSpec((_IN, tile), lambda i: (0, i)),  # pipelined x tile
            const(p1.shape), const(p2.shape), const(p3.shape),
        ],
        out_specs=pl.BlockSpec((1, tile), lambda i: (0, i)),  # lane-dense output tile
        compiler_params=pltpu.CompilerParams(
            dimension_semantics=("parallel",)),  # shard grid steps across TCs (v7x)
    )(xt, p1, p2, p3)

    return out_t[:, :n].T  # (n, 1), matching torch's output shape


def init_params(key):
    # torch.nn.Linear init: U(-1/sqrt(fan_in), 1/sqrt(fan_in)); weight is (out, in).
    def linear(k, fan_in, fan_out):
        kw, kb = jax.random.split(k)
        bound = 1.0 / jnp.sqrt(jnp.float32(fan_in))
        w = jax.random.uniform(kw, (fan_out, fan_in), jnp.float32, -bound, bound)
        b = jax.random.uniform(kb, (fan_out,), jnp.float32, -bound, bound)
        return w, b

    k1, k2, k3 = jax.random.split(key, 3)
    w1, b1 = linear(k1, _IN, _H1)
    w2, b2 = linear(k2, _H1, _H2)
    w3, b3 = linear(k3, _H2, _OUT)
    return w1, b1, w2, b2, w3, b3


def _reference(x, params):
    w1, b1, w2, b2, w3, b3 = params
    h = jax.nn.sigmoid(x @ w1.T + b1)
    h = jax.nn.sigmoid(h @ w2.T + b2)
    return jax.nn.sigmoid(h @ w3.T + b3)


if __name__ == "__main__":
    key = jax.random.PRNGKey(0)
    kx, kp = jax.random.split(key)
    params = init_params(kp)

    # Small case matching the module's natural input: (batch=8, features=8).
    x = jax.random.normal(kx, (8, _IN), dtype=jnp.float32)
    out = jax.block_until_ready(mlp_forward(x, *params))
    ref = _reference(x, params)
    assert out.shape == (8, 1)
    assert jnp.allclose(out, ref, atol=1e-5), "mismatch vs reference (small batch)"

    # Multi-tile case with a batch that is not a tile multiple (exercises grid + padding).
    x2 = jax.random.normal(jax.random.PRNGKey(1), (300, _IN), dtype=jnp.float32)
    out2 = jax.block_until_ready(mlp_forward(x2, *params, tile_n=128))
    ref2 = _reference(x2, params)
    assert out2.shape == (300, 1)
    assert jnp.allclose(out2, ref2, atol=1e-5), "mismatch vs reference (multi-tile)"

    print("KERNEL_OK")
</pallas_src>

<mosaic_0001>
module attributes {stable_mosaic.version = 11 : i64} {
  func.func @_mlp_kernel(%arg0: i32, %arg1: memref<8x128xf32, #tpu.memory_space<vmem>>, %arg2: memref<6x9xf32, #tpu.memory_space<vmem>>, %arg3: memref<4x7xf32, #tpu.memory_space<vmem>>, %arg4: memref<1x5xf32, #tpu.memory_space<vmem>>, %arg5: memref<1x128xf32, #tpu.memory_space<vmem>>) attributes {dimension_semantics = [#tpu.dimension_semantics<parallel>], iteration_bounds = array<i64: 1>, scalar_prefetch = 0 : i64, scratch_operands = 0 : i64, tpu.core_type = #tpu.core_type<tc>, window_params = [{transform_indices = @transform_0, window_bounds = array<i64: 8, 128>}, {pipeline_mode = #tpu.pipeline_mode<synchronous>, transform_indices = @transform_1, window_bounds = array<i64: 6, 9>}, {pipeline_mode = #tpu.pipeline_mode<synchronous>, transform_indices = @transform_2, window_bounds = array<i64: 4, 7>}, {pipeline_mode = #tpu.pipeline_mode<synchronous>, transform_indices = @transform_3, window_bounds = array<i64: 1, 5>}, {transform_indices = @transform_4, window_bounds = array<i64: 1, 128>}]} {
    %c0 = arith.constant 0 : index
    %c0_0 = arith.constant 0 : index
    %0 = vector.load %arg1[%c0, %c0_0] : memref<8x128xf32, #tpu.memory_space<vmem>>, vector<8x128xf32>
    %c0_1 = arith.constant 0 : index
    %c0_2 = arith.constant 0 : index
    %1 = vector.load %arg2[%c0_1, %c0_2] : memref<6x9xf32, #tpu.memory_space<vmem>>, vector<6x8xf32>
    %cst = arith.constant dense<0.000000e+00> : vector<6x128xf32>
    %2 = tpu.matmul %1, %0, %cst {dimension_numbers = #tpu.dot_dimension_numbers<[1], [0], [0], [1], [0, 0, 1, 1], [], []>} : vector<6x8xf32>, vector<8x128xf32>, vector<6x128xf32> -> vector<6x128xf32>
    %c0_3 = arith.constant 0 : index
    %c8 = arith.constant 8 : index
    %3 = vector.load %arg2[%c0_3, %c8] : memref<6x9xf32, #tpu.memory_space<vmem>>, vector<6x1xf32>
    %4 = vector.broadcast %3 : vector<6x1xf32> to vector<6x128xf32>
    %5 = arith.addf %2, %4 : vector<6x128xf32>
    %6 = arith.negf %5 : vector<6x128xf32>
    %7 = math.exp %6 : vector<6x128xf32>
    %cst_4 = arith.constant 1.000000e+00 : f32
    %8 = vector.broadcast %cst_4 : f32 to vector<6x128xf32>
    %9 = arith.addf %8, %7 : vector<6x128xf32>
    %10 = arith.divf %8, %9 : vector<6x128xf32>
    %c0_5 = arith.constant 0 : index
    %c0_6 = arith.constant 0 : index
    %11 = vector.load %arg3[%c0_5, %c0_6] : memref<4x7xf32, #tpu.memory_space<vmem>>, vector<4x6xf32>
    %cst_7 = arith.constant dense<0.000000e+00> : vector<4x128xf32>
    %12 = tpu.matmul %11, %10, %cst_7 {dimension_numbers = #tpu.dot_dimension_numbers<[1], [0], [0], [1], [0, 0, 1, 1], [], []>} : vector<4x6xf32>, vector<6x128xf32>, vector<4x128xf32> -> vector<4x128xf32>
    %c0_8 = arith.constant 0 : index
    %c6 = arith.constant 6 : index
    %13 = vector.load %arg3[%c0_8, %c6] : memref<4x7xf32, #tpu.memory_space<vmem>>, vector<4x1xf32>
    %14 = vector.broadcast %13 : vector<4x1xf32> to vector<4x128xf32>
    %15 = arith.addf %12, %14 : vector<4x128xf32>
    %16 = arith.negf %15 : vector<4x128xf32>
    %17 = math.exp %16 : vector<4x128xf32>
    %cst_9 = arith.constant 1.000000e+00 : f32
    %18 = vector.broadcast %cst_9 : f32 to vector<4x128xf32>
    %19 = arith.addf %18, %17 : vector<4x128xf32>
    %20 = arith.divf %18, %19 : vector<4x128xf32>
    %c0_10 = arith.constant 0 : index
    %c0_11 = arith.constant 0 : index
    %21 = vector.load %arg4[%c0_10, %c0_11] : memref<1x5xf32, #tpu.memory_space<vmem>>, vector<1x4xf32>
    %cst_12 = arith.constant dense<0.000000e+00> : vector<1x128xf32>
    %22 = tpu.matmul %21, %20, %cst_12 {dimension_numbers = #tpu.dot_dimension_numbers<[1], [0], [0], [1], [0, 0, 1, 1], [], []>} : vector<1x4xf32>, vector<4x128xf32>, vector<1x128xf32> -> vector<1x128xf32>
    %c0_13 = arith.constant 0 : index
    %c4 = arith.constant 4 : index
    %23 = vector.load %arg4[%c0_13, %c4] : memref<1x5xf32, #tpu.memory_space<vmem>>, vector<1x1xf32>
    %24 = vector.broadcast %23 : vector<1x1xf32> to vector<1x128xf32>
    %25 = arith.addf %22, %24 : vector<1x128xf32>
    %26 = arith.negf %25 : vector<1x128xf32>
    %27 = math.exp %26 : vector<1x128xf32>
    %cst_14 = arith.constant 1.000000e+00 : f32
    %28 = vector.broadcast %cst_14 : f32 to vector<1x128xf32>
    %29 = arith.addf %28, %27 : vector<1x128xf32>
    %30 = arith.divf %28, %29 : vector<1x128xf32>
    %c0_15 = arith.constant 0 : index
    %c0_16 = arith.constant 0 : index
    %31 = vector.load %arg5[%c0_15, %c0_16] : memref<1x128xf32, #tpu.memory_space<vmem>>, vector<1x128xf32>
    tpu.vector_store %arg5[%c0_15, %c0_16], %30 {strides = array<i32>} : memref<1x128xf32, #tpu.memory_space<vmem>>, vector<1x128xf32>,
    return
  }
  func.func @transform_0(%arg0: i32) -> (i32, i32) {
    %c0_i32 = arith.constant 0 : i32
    %c0_i32_0 = arith.constant 0 : i32
    return %c0_i32, %arg0 : i32, i32
  }
  func.func @transform_1(%arg0: i32) -> (i32, i32) {
    %c0_i32 = arith.constant 0 : i32
    %c0_i32_0 = arith.constant 0 : i32
    %c0_i32_1 = arith.constant 0 : i32
    return %c0_i32, %c0_i32_0 : i32, i32
  }
  func.func @transform_2(%arg0: i32) -> (i32, i32) {
    %c0_i32 = arith.constant 0 : i32
    %c0_i32_0 = arith.constant 0 : i32
    %c0_i32_1 = arith.constant 0 : i32
    return %c0_i32, %c0_i32_0 : i32, i32
  }
  func.func @transform_3(%arg0: i32) -> (i32, i32) {
    %c0_i32 = arith.constant 0 : i32
    %c0_i32_0 = arith.constant 0 : i32
    %c0_i32_1 = arith.constant 0 : i32
    return %c0_i32, %c0_i32_0 : i32, i32
  }
  func.func @transform_4(%arg0: i32) -> (i32, i32) {
    %c0_i32 = arith.constant 0 : i32
    %c0_i32_0 = arith.constant 0 : i32
    return %c0_i32, %arg0 : i32, i32
  }
}

</mosaic_0001>

<bundles_post_ra>
// kernel: mlp_forward.1
= control target key start
LH: loop header
LB: loop body
LE: loop exit
PB: predicated region body
PF: predicated region fallthrough
CT: control target
= control target key end

     0   :  { %vm24_vm0 = vcmask 64512   ;;  %v203_v2 = vmov 8   ;;  %v204_v7 = vmov 6   ;;  %vm75_vm4 = vcmask 1045504   ;;  %s246_s0 = inlined_call_operand.vmem [shape: f32[8,128], index: 0, kind: input, shape index: {}]   ;;  %s247_s1 = inlined_call_operand.vmem [shape: f32[6,9], index: 1, kind: input, shape index: {}]   ;;  %s248_s2 = inlined_call_operand.vmem [shape: f32[4,7], index: 2, kind: input, shape index: {}]   ;;  %s249_s3 = inlined_call_operand.vmem [shape: f32[1,5], index: 3, kind: input, shape index: {}]   ;;  %s250_s4 = inlined_call_operand.vmem [shape: f32[1,128], index: 4, kind: output, shape index: {}]  }
   0x1   :  { %v17_v0 = vld [vmem:[%s246_s0] sm:$0xff]  ;;  %187 = vset.pattern.permute.xlu0 %v203_v2  ;;  %vm72_vm6 = vcmask 48128   ;;  %v205_v25 = vmov 4   ;;  %vm128_vm10 = vcmask 1043456   ;;  %vm125_vm12 = vcmask 31744  }
   0x2   :  { %v18_v1 = vld [vmem:[%s247_s1] sm:$0x3f]  ;;  %42 = vmatpush.msra.mxu0 %v17_v0  ;;  %189 = vset.pattern.permute.xlu1 %v205_v25 }
   0x3   :  { %21 = vperm.xlu0 %187, %v18_v1   ;;  %176 = vmatmul.msk.f32.vlgmr.msra.gmra.mxu0 %vm24_vm0, %v18_v1  ;;  %v66_v6 = vld [vmem:[%s248_s2] sm:$0xf] }
   0x4   :  { %v118_v24 = vld [vmem:[%s249_s3] sm:$0x1] }
   0x5   :  { %121 = vperm.xlu1 %189, %v118_v24  }
   0xb   :  { %188 = vset.pattern.permute.xlu0 %v204_v7 }
   0xc   :  { %69 = vperm.xlu0 %188, %v66_v6  }
  0x14   :  { %190 = vset.pattern.permute.xlu0 %v205_v25 }
  0x75   :  { %v22_v3 = vpop.permute.xlu0 %21 }
  0x77   :  { %v122_v39 = vpop.permute.xlu1 %121 }
  0x78   :  { %v124_v40 = vperm.slane %v122_v39, 0 }
  0x7e   :  { %v70_v21 = vpop.permute.xlu0 %69 }
  0x80   :  { %v44_v4 = vpop.f32.mrf.mxu0 }
  0x81   :  { %v45_v5 = vadd.f32 %v44_v4, %v22_v3 }
  0x83   :  { %v177_v8 = vmul.f32 -1.442695, %v45_v5 }
  0x85   :  { %191 = vpow2.f32 %v177_v8 }
  0x8b   :  { %v192_v9 = vpop.eup %191 }
  0x8c   :  { %v50_v10 = vadd.f32 1.0, %v192_v9 }
  0x8e   :  { %193 = vrcp.f32 %v50_v10  ;;  %v62_v14 = vand.u32 2147483648, %v50_v10  ;;  %v60_v16 = vand.u32 2147483647, %v50_v10  ;;  %vm56_vm2 = vweird.f32 %v50_v10 }
  0x90   :  { %v63_v18 = vor.u32 1.1754944e-38, %v62_v14  ;;  %vm61_vm5 = vcmp.eq.f32.partialorder %v60_v16, 8.507059e+37 }
  0x94   :  { %v194_v11 = vpop.eup %193 }
  0x95   :  { %v52_v12 = vmul.f32 %v194_v11, %v50_v10  ;;  %vm57_vm1 = vweird.f32 %v194_v11 }
  0x96   :  { %vm58_vm3 = vmor %vm56_vm2, %vm57_vm1 }
  0x97   :  { %v53_v13 = vsub.f32 1.0, %v52_v12 }
  0x99   :  { %v54_v15 = vmul.f32 %v194_v11, %v53_v13 }
  0x9b   :  { %v55_v17 = vadd.f32 %v194_v11, %v54_v15 }
  0x9d   :  { %v59_v19 = vsel %vm58_vm3, %v194_v11, %v55_v17 }
  0x9e   :  { %v64_v20 = vsel %vm61_vm5, %v63_v18, %v59_v19 }
  0x9f   :  { %178 = vmatpush.msk.msra.mxu1 %vm75_vm4, %v64_v20 }
  0xa0   :  { %179 = vmatmul.msk.f32.vlgmr.msra.gmra.mxu1 %vm72_vm6, %v66_v6 }
 0x11d   :  { %v96_v22 = vpop.f32.mrf.mxu1 }
 0x11e   :  { %v97_v23 = vadd.f32 %v96_v22, %v70_v21 }
 0x120   :  { %v180_v26 = vmul.f32 -1.442695, %v97_v23 }
 0x122   :  { %195 = vpow2.f32 %v180_v26 }
 0x128   :  { %v196_v27 = vpop.eup %195 }
 0x129   :  { %v102_v28 = vadd.f32 1.0, %v196_v27 }
 0x12b   :  { %197 = vrcp.f32 %v102_v28  ;;  %v114_v32 = vand.u32 2147483648, %v102_v28  ;;  %v112_v34 = vand.u32 2147483647, %v102_v28  ;;  %vm108_vm8 = vweird.f32 %v102_v28 }
 0x12d   :  { %v115_v36 = vor.u32 1.1754944e-38, %v114_v32  ;;  %vm113_vm11 = vcmp.eq.f32.partialorder %v112_v34, 8.507059e+37 }
 0x131   :  { %v198_v29 = vpop.eup %197 }
 0x132   :  { %v104_v30 = vmul.f32 %v198_v29, %v102_v28  ;;  %vm109_vm7 = vweird.f32 %v198_v29 }
 0x133   :  { %vm110_vm9 = vmor %vm108_vm8, %vm109_vm7 }
 0x134   :  { %v105_v31 = vsub.f32 1.0, %v104_v30 }
 0x136   :  { %v106_v33 = vmul.f32 %v198_v29, %v105_v31 }
 0x138   :  { %v107_v35 = vadd.f32 %v198_v29, %v106_v33 }
 0x13a   :  { %v111_v37 = vsel %vm110_vm9, %v198_v29, %v107_v35 }
 0x13b   :  { %v116_v38 = vsel %vm113_vm11, %v115_v36, %v111_v37 }
 0x13c   :  { %181 = vmatpush.msk.msra.mxu2 %vm128_vm10, %v116_v38 }
 0x13d   :  { %182 = vmatmul.msk.f32.vlgmr.msra.gmra.mxu2 %vm125_vm12, %v118_v24 }
 0x1c0   :  { %v149_v41 = vpop.f32.mrf.mxu2 }
 0x1c1   :  { %v150_v42 = vadd.f32 %v149_v41, %v124_v40 }
 0x1c3   :  { %v183_v43 = vmul.f32 -1.442695, %v150_v42 }
 0x1c5   :  { %199 = vpow2.f32 %v183_v43 }
 0x1cb   :  { %v200_v44 = vpop.eup %199 }
 0x1cc   :  { %v155_v45 = vadd.f32 1.0, %v200_v44 }
 0x1ce   :  { %201 = vrcp.f32 %v155_v45  ;;  %v167_v49 = vand.u32 2147483648, %v155_v45  ;;  %v165_v51 = vand.u32 2147483647, %v155_v45  ;;  %vm161_vm14 = vweird.f32 %v155_v45 }
 0x1d0   :  { %v168_v53 = vor.u32 1.1754944e-38, %v167_v49  ;;  %vm166_vm0 = vcmp.eq.f32.partialorder %v165_v51, 8.507059e+37 }
 0x1d4   :  { %v202_v46 = vpop.eup %201 }
 0x1d5   :  { %v157_v47 = vmul.f32 %v202_v46, %v155_v45  ;;  %vm162_vm13 = vweird.f32 %v202_v46 }
 0x1d6   :  { %vm163_vm15 = vmor %vm161_vm14, %vm162_vm13 }
 0x1d7   :  { %v158_v48 = vsub.f32 1.0, %v157_v47 }
 0x1d9   :  { %v159_v50 = vmul.f32 %v202_v46, %v158_v48 }
 0x1db   :  { %v160_v52 = vadd.f32 %v202_v46, %v159_v50 }
 0x1dd   :  { %v164_v54 = vsel %vm163_vm15, %v202_v46, %v160_v52 }
 0x1de   :  { %v169_v55 = vsel %vm166_vm0, %v168_v53, %v164_v54 }
 0x1df   :  { %171 = vst [vmem:[%s250_s4] sm:$0x1] %v169_v55 }

</bundles_post_ra>
